<compile_context>
chip_gen: v5e
topology: v5e:2x2
jax: 0.10.0
libtpu: 0.0.40
codegen_flags: <defaults>
</compile_context>

<pallas_src>
import jax
import jax.numpy as jnp
from jax.experimental import pallas as pl
from jax.experimental.pallas import tpu as pltpu


def _round_up(n, m):
    return (n + m - 1) // m * m


def _lstm_kernel(x_ref,
                 w_ih0_ref, w_hh0_ref, b0_ref,
                 w_ih1_ref, w_hh1_ref, b1_ref,
                 w_lin_ref, b_lin_ref,
                 out_ref,
                 xw0_ref, hs_ref):
    S, BT, _ = x_ref.shape
    H = w_hh0_ref.shape[0]
    VP = out_ref.shape[-1]

    # ---- Prologue (embarrassingly parallel, off the serial critical path):
    # layer-0 input contribution + fused bias for every timestep at once:
    #   xw0[s, b, :] = x[s, b, 0] * w_ih0 + (b_ih0 + b_hh0)
    xw0_ref[...] = x_ref[...] * w_ih0_ref[...] + b0_ref[...]

    # Hoist the recurrent weights once (small at these sizes; move back into
    # the loop body if H grows enough that ld/st slots show spills).
    w_hh0 = w_hh0_ref[...]
    w_ih1 = w_ih1_ref[...]
    w_hh1 = w_hh1_ref[...]
    b1 = b1_ref[...]

    def activations(gates):
        # Gate columns packed (i, f, o, g): one sigmoid covers the first 3H
        # columns and one tanh covers the last H (2 EUP pushes per cell).
        sig = jax.nn.sigmoid(gates[:, :3 * H])
        return (sig[:, 0:H], sig[:, H:2 * H], sig[:, 2 * H:3 * H],
                jnp.tanh(gates[:, 3 * H:]))

    def step(t, carry):
        h0, c0, h1, c1 = carry

        # Layer 0: input term precomputed; only the recurrent matmul is serial.
        gates0 = xw0_ref[t] + jnp.dot(h0, w_hh0,
                                      preferred_element_type=jnp.float32)
        i0, f0, o0, g0 = activations(gates0)
        c0 = f0 * c0 + i0 * g0
        h0 = o0 * jnp.tanh(c0)

        # Layer 1: two matmuls on register-carried state (no concat/staging).
        gates1 = (jnp.dot(h0, w_ih1, preferred_element_type=jnp.float32)
                  + jnp.dot(h1, w_hh1, preferred_element_type=jnp.float32)
                  + b1)
        i1, f1, o1, g1 = activations(gates1)
        c1 = f1 * c1 + i1 * g1
        h1 = o1 * jnp.tanh(c1)

        # Leading-axis indexed, sublane-aligned store of this step's output.
        hs_ref[t] = h1
        return h0, c0, h1, c1

    # Partial unroll (4) keeps LLO scheduling visibility while bounding vreg
    # live ranges (a full Python unroll does not bound them).
    unroll = next((u for u in (4, 2) if S % u == 0), 1)

    def block_body(tb, carry):
        for u in range(unroll):
            carry = step(tb * unroll + u, carry)
        return carry

    z = jnp.zeros((BT, H), jnp.float32)
    jax.lax.fori_loop(0, S // unroll, block_body, (z, z, z, z))

    # ---- Epilogue: one batched vocab projection with a lane-dense store
    # (VP is padded to a multiple of 128 in the wrapper).
    hs = hs_ref[...].reshape(S * BT, H)
    proj = (jnp.dot(hs, w_lin_ref[...], preferred_element_type=jnp.float32)
            + b_lin_ref[...])
    out_ref[...] = proj.reshape(S, BT, VP)


def text_generation_forward(x, params):
    """x: (S, B, 1) float32 -> (S*B, V) float32 (== linear(lstm_out.view(-1, H)))."""
    S, B, _ = x.shape
    H = params["w_hh0"].shape[0]
    V = params["w_lin"].shape[1]

    BP = _round_up(B, 8)      # sublane-dense batch
    VP = _round_up(V, 128)    # lane-dense vocab for the output store

    xp = jnp.pad(x, ((0, 0), (0, BP - B), (0, 0)))
    w_lin = jnp.pad(params["w_lin"], ((0, 0), (0, VP - V)))
    b_lin = jnp.pad(params["b_lin"], ((0, 0), (0, VP - V)))

    # One batch tile per TensorCore when the padded batch splits into two
    # sublane-aligned halves (v7x megacore); otherwise a single tile.
    BT = BP // 2 if (BP % 16 == 0) else BP
    nbt = BP // BT

    # Explicit VMEM budget (double-buffered blocks + weights + scratch), 2x headroom.
    # TODO(synk): for production shapes (large S*B*H), chunk hs/xw0 over time and
    # run the vocab projection as a separate tiled matmul pallas_call.
    per_core_bytes = 4 * (
        2 * (S * BT * 1 + S * BT * VP)                      # x + out blocks
        + 3 * (4 * H) + 3 * (H * 4 * H) + H * VP + VP       # weights/biases
        + S * BT * 4 * H + S * BT * H)                      # scratch (xw0 + hs)
    vmem_limit = int(min(64 * 1024 * 1024,
                         max(16 * 1024 * 1024, 2 * per_core_bytes)))

    out = pl.pallas_call(
        _lstm_kernel,
        out_shape=jax.ShapeDtypeStruct((S, BP, VP), jnp.float32),
        grid_spec=pltpu.PrefetchScalarGridSpec(
            num_scalar_prefetch=0,
            grid=(nbt,),
            in_specs=[
                pl.BlockSpec((S, BT, 1), lambda i: (0, i, 0)),     # x
                pl.BlockSpec((1, 4 * H), lambda i: (0, 0)),        # w_ih0
                pl.BlockSpec((H, 4 * H), lambda i: (0, 0)),        # w_hh0
                pl.BlockSpec((1, 4 * H), lambda i: (0, 0)),        # b0
                pl.BlockSpec((H, 4 * H), lambda i: (0, 0)),        # w_ih1
                pl.BlockSpec((H, 4 * H), lambda i: (0, 0)),        # w_hh1
                pl.BlockSpec((1, 4 * H), lambda i: (0, 0)),        # b1
                pl.BlockSpec((H, VP), lambda i: (0, 0)),           # w_lin (padded)
                pl.BlockSpec((1, VP), lambda i: (0, 0)),           # b_lin (padded)
            ],
            out_specs=pl.BlockSpec((S, BT, VP), lambda i: (0, i, 0)),
            scratch_shapes=[
                pltpu.VMEM((S, BT, 4 * H), jnp.float32),   # xw0 prologue
                pltpu.VMEM((S, BT, H), jnp.float32),       # per-step h1
            ],
        ),
        compiler_params=pltpu.CompilerParams(
            dimension_semantics=("parallel",),
            vmem_limit_bytes=vmem_limit,
        ),
    )(xp,
      params["w_ih0"], params["w_hh0"], params["b0"],
      params["w_ih1"], params["w_hh1"], params["b1"],
      w_lin, b_lin)

    # Drop batch/vocab padding, flatten time-major like lstm_out.view(-1, H).
    return out[:, :B, :V].reshape(S * B, V)


def init_torch_style_params(key, hidden, vocab):
    """PyTorch-layout parameters: nn.LSTM(1, H, num_layers=2) + nn.Linear(H, V),
    uniform(-1/sqrt(H), 1/sqrt(H)) init, gate order (i, f, g, o) along 4H."""
    k = 1.0 / jnp.sqrt(jnp.float32(hidden))
    keys = jax.random.split(key, 10)
    u = lambda kk, shape: jax.random.uniform(kk, shape, jnp.float32, -k, k)
    return {
        "w_ih_l0": u(keys[0], (4 * hidden, 1)),
        "w_hh_l0": u(keys[1], (4 * hidden, hidden)),
        "b_ih_l0": u(keys[2], (4 * hidden,)),
        "b_hh_l0": u(keys[3], (4 * hidden,)),
        "w_ih_l1": u(keys[4], (4 * hidden, hidden)),
        "w_hh_l1": u(keys[5], (4 * hidden, hidden)),
        "b_ih_l1": u(keys[6], (4 * hidden,)),
        "b_hh_l1": u(keys[7], (4 * hidden,)),
        "w_lin":   u(keys[8], (vocab, hidden)),
        "b_lin":   u(keys[9], (vocab,)),
    }


def pack_params(tp):
    """Convert PyTorch-layout weights into the kernel's packed layout:
       - transposed to row-major (in, out) matmuls,
       - gate columns reordered (i, f, g, o) -> (i, f, o, g),
       - ih/hh biases pre-summed per layer."""
    def reorder(w):  # (4H, ...) or (4H,) in torch gate order -> (i, f, o, g)
        i, f, g, o = jnp.split(w, 4, axis=0)
        return jnp.concatenate([i, f, o, g], axis=0)

    return {
        "w_ih0": reorder(tp["w_ih_l0"]).T,                               # (1, 4H)
        "w_hh0": reorder(tp["w_hh_l0"]).T,                               # (H, 4H)
        "b0":    reorder(tp["b_ih_l0"] + tp["b_hh_l0"])[None, :],        # (1, 4H)
        "w_ih1": reorder(tp["w_ih_l1"]).T,                               # (H, 4H)
        "w_hh1": reorder(tp["w_hh_l1"]).T,                               # (H, 4H)
        "b1":    reorder(tp["b_ih_l1"] + tp["b_hh_l1"])[None, :],        # (1, 4H)
        "w_lin": tp["w_lin"].T,                                          # (H, V)
        "b_lin": tp["b_lin"][None, :],                                   # (1, V)
    }


def _reference_forward(x, tp):
    """Pure-JAX reference mirroring PyTorch's nn.LSTM/nn.Linear semantics."""
    S, B, _ = x.shape
    H = tp["w_hh_l0"].shape[1]

    def cell(inp, h, c, w_ih, w_hh, b_ih, b_hh):
        gates = inp @ w_ih.T + h @ w_hh.T + b_ih + b_hh   # torch gate order i,f,g,o
        i = jax.nn.sigmoid(gates[:, 0:H])
        f = jax.nn.sigmoid(gates[:, H:2 * H])
        g = jnp.tanh(gates[:, 2 * H:3 * H])
        o = jax.nn.sigmoid(gates[:, 3 * H:4 * H])
        c_new = f * c + i * g
        h_new = o * jnp.tanh(c_new)
        return h_new, c_new

    def step(carry, x_t):
        h0, c0, h1, c1 = carry
        h0, c0 = cell(x_t, h0, c0, tp["w_ih_l0"], tp["w_hh_l0"],
                      tp["b_ih_l0"], tp["b_hh_l0"])
        h1, c1 = cell(h0, h1, c1, tp["w_ih_l1"], tp["w_hh_l1"],
                      tp["b_ih_l1"], tp["b_hh_l1"])
        return (h0, c0, h1, c1), h1

    z = jnp.zeros((B, H), jnp.float32)
    _, hs = jax.lax.scan(step, (z, z, z, z), x)           # (S, B, H)
    return hs.reshape(S * B, H) @ tp["w_lin"].T + tp["b_lin"]


if __name__ == "__main__":
    SEQ, BATCH, HIDDEN, VOCAB = 8, 4, 32, 16

    key = jax.random.PRNGKey(0)
    k_param, k_x = jax.random.split(key)
    torch_params = init_torch_style_params(k_param, HIDDEN, VOCAB)
    params = pack_params(torch_params)
    x = jax.random.normal(k_x, (SEQ, BATCH, 1), jnp.float32)

    out = jax.block_until_ready(text_generation_forward(x, params))
    ref = _reference_forward(x, torch_params)

    assert out.shape == (SEQ * BATCH, VOCAB)
    assert jnp.allclose(out, ref, atol=1e-5, rtol=1e-5), \
        float(jnp.max(jnp.abs(out - ref)))
    print("KERNEL_OK")
</pallas_src>

<mosaic_0001>
module attributes {stable_mosaic.version = 11 : i64} {
  func.func @_lstm_kernel(%arg0: i32, %arg1: memref<8x8x1xf32, #tpu.memory_space<vmem>>, %arg2: memref<1x128xf32, #tpu.memory_space<vmem>>, %arg3: memref<32x128xf32, #tpu.memory_space<vmem>>, %arg4: memref<1x128xf32, #tpu.memory_space<vmem>>, %arg5: memref<32x128xf32, #tpu.memory_space<vmem>>, %arg6: memref<32x128xf32, #tpu.memory_space<vmem>>, %arg7: memref<1x128xf32, #tpu.memory_space<vmem>>, %arg8: memref<32x128xf32, #tpu.memory_space<vmem>>, %arg9: memref<1x128xf32, #tpu.memory_space<vmem>>, %arg10: memref<8x8x128xf32, #tpu.memory_space<vmem>>, %arg11: memref<8x8x128xf32, #tpu.memory_space<vmem>>, %arg12: memref<8x8x32xf32, #tpu.memory_space<vmem>>) attributes {dimension_semantics = [#tpu.dimension_semantics<parallel>], iteration_bounds = array<i64: 1>, scalar_prefetch = 0 : i64, scratch_operands = 2 : i64, tpu.core_type = #tpu.core_type<tc>, window_params = [{transform_indices = @transform_0, window_bounds = array<i64: 8, 8, 1>}, {pipeline_mode = #tpu.pipeline_mode<synchronous>, transform_indices = @transform_1, window_bounds = array<i64: 1, 128>}, {pipeline_mode = #tpu.pipeline_mode<synchronous>, transform_indices = @transform_2, window_bounds = array<i64: 32, 128>}, {pipeline_mode = #tpu.pipeline_mode<synchronous>, transform_indices = @transform_3, window_bounds = array<i64: 1, 128>}, {pipeline_mode = #tpu.pipeline_mode<synchronous>, transform_indices = @transform_4, window_bounds = array<i64: 32, 128>}, {pipeline_mode = #tpu.pipeline_mode<synchronous>, transform_indices = @transform_5, window_bounds = array<i64: 32, 128>}, {pipeline_mode = #tpu.pipeline_mode<synchronous>, transform_indices = @transform_6, window_bounds = array<i64: 1, 128>}, {pipeline_mode = #tpu.pipeline_mode<synchronous>, transform_indices = @transform_7, window_bounds = array<i64: 32, 128>}, {pipeline_mode = #tpu.pipeline_mode<synchronous>, transform_indices = @transform_8, window_bounds = array<i64: 1, 128>}, {transform_indices = @transform_9, window_bounds = array<i64: 8, 8, 128>}]} {
    %c0 = arith.constant 0 : index
    %c0_0 = arith.constant 0 : index
    %c0_1 = arith.constant 0 : index
    %0 = vector.load %arg1[%c0, %c0_0, %c0_1] : memref<8x8x1xf32, #tpu.memory_space<vmem>>, vector<8x8x1xf32>
    %c0_2 = arith.constant 0 : index
    %c0_3 = arith.constant 0 : index
    %1 = vector.load %arg2[%c0_2, %c0_3] : memref<1x128xf32, #tpu.memory_space<vmem>>, vector<1x128xf32>
    %2 = vector.shape_cast %1 : vector<1x128xf32> to vector<1x1x128xf32>
    %3 = vector.broadcast %0 : vector<8x8x1xf32> to vector<8x8x128xf32>
    %4 = vector.broadcast %2 : vector<1x1x128xf32> to vector<8x8x128xf32>
    %5 = arith.mulf %3, %4 : vector<8x8x128xf32>
    %c0_4 = arith.constant 0 : index
    %c0_5 = arith.constant 0 : index
    %6 = vector.load %arg4[%c0_4, %c0_5] : memref<1x128xf32, #tpu.memory_space<vmem>>, vector<1x128xf32>
    %7 = vector.shape_cast %6 : vector<1x128xf32> to vector<1x1x128xf32>
    %8 = vector.broadcast %7 : vector<1x1x128xf32> to vector<8x8x128xf32>
    %9 = arith.addf %5, %8 : vector<8x8x128xf32>
    %c0_6 = arith.constant 0 : index
    %c0_7 = arith.constant 0 : index
    %c0_8 = arith.constant 0 : index
    %10 = vector.load %arg11[%c0_6, %c0_7, %c0_8] : memref<8x8x128xf32, #tpu.memory_space<vmem>>, vector<8x8x128xf32>
    tpu.vector_store %arg11[%c0_6, %c0_7, %c0_8], %9 {strides = array<i32>} : memref<8x8x128xf32, #tpu.memory_space<vmem>>, vector<8x8x128xf32>,
    %c0_9 = arith.constant 0 : index
    %c0_10 = arith.constant 0 : index
    %11 = vector.load %arg3[%c0_9, %c0_10] : memref<32x128xf32, #tpu.memory_space<vmem>>, vector<32x128xf32>
    %c0_11 = arith.constant 0 : index
    %c0_12 = arith.constant 0 : index
    %12 = vector.load %arg5[%c0_11, %c0_12] : memref<32x128xf32, #tpu.memory_space<vmem>>, vector<32x128xf32>
    %c0_13 = arith.constant 0 : index
    %c0_14 = arith.constant 0 : index
    %13 = vector.load %arg6[%c0_13, %c0_14] : memref<32x128xf32, #tpu.memory_space<vmem>>, vector<32x128xf32>
    %c0_15 = arith.constant 0 : index
    %c0_16 = arith.constant 0 : index
    %14 = vector.load %arg7[%c0_15, %c0_16] : memref<1x128xf32, #tpu.memory_space<vmem>>, vector<1x128xf32>
    %cst = arith.constant 0.000000e+00 : f32
    %15 = vector.broadcast %cst : f32 to vector<8x32xf32>
    %c0_i32 = arith.constant 0 : i32
    %c2_i32 = arith.constant 2 : i32
    %16 = arith.addi %c0_i32, %c2_i32 : i32
    %c1_i32 = arith.constant 1 : i32
    %17:4 = scf.for %arg13 = %c0_i32 to %16 step %c1_i32 iter_args(%arg14 = %15, %arg15 = %15, %arg16 = %15, %arg17 = %15) -> (vector<8x32xf32>, vector<8x32xf32>, vector<8x32xf32>, vector<8x32xf32>)  : i32 {
      %c4_i32 = arith.constant 4 : i32
      %27 = arith.muli %arg13, %c4_i32 : i32
      %c0_i32_29 = arith.constant 0 : i32
      %28 = arith.addi %27, %c0_i32_29 : i32
      %29 = arith.index_cast %28 : i32 to index
      %c0_30 = arith.constant 0 : index
      %c0_31 = arith.constant 0 : index
      %30 = vector.load %arg11[%29, %c0_30, %c0_31] : memref<8x8x128xf32, #tpu.memory_space<vmem>>, vector<1x8x128xf32>
      %31 = vector.shape_cast %30 : vector<1x8x128xf32> to vector<8x128xf32>
      %cst_32 = arith.constant dense<0.000000e+00> : vector<8x128xf32>
      %32 = tpu.matmul %arg14, %11, %cst_32 {dimension_numbers = #tpu.dot_dimension_numbers<[1], [0], [0], [1], [0, 0, 1, 1], [], []>} : vector<8x32xf32>, vector<32x128xf32>, vector<8x128xf32> -> vector<8x128xf32>
      %33 = arith.addf %31, %32 : vector<8x128xf32>
      %34 = vector.extract_strided_slice %33 {offsets = [0, 0], sizes = [8, 96], strides = [1, 1]} : vector<8x128xf32> to vector<8x96xf32>
      %35 = arith.negf %34 : vector<8x96xf32>
      %36 = math.exp %35 : vector<8x96xf32>
      %cst_33 = arith.constant 1.000000e+00 : f32
      %37 = vector.broadcast %cst_33 : f32 to vector<8x96xf32>
      %38 = arith.addf %37, %36 : vector<8x96xf32>
      %39 = arith.divf %37, %38 : vector<8x96xf32>
      %40 = vector.extract_strided_slice %39 {offsets = [0, 0], sizes = [8, 32], strides = [1, 1]} : vector<8x96xf32> to vector<8x32xf32>
      %41 = vector.extract_strided_slice %39 {offsets = [0, 32], sizes = [8, 32], strides = [1, 1]} : vector<8x96xf32> to vector<8x32xf32>
      %42 = vector.extract_strided_slice %39 {offsets = [0, 64], sizes = [8, 32], strides = [1, 1]} : vector<8x96xf32> to vector<8x32xf32>
      %43 = vector.extract_strided_slice %33 {offsets = [0, 96], sizes = [8, 32], strides = [1, 1]} : vector<8x128xf32> to vector<8x32xf32>
      %44 = math.tanh %43 : vector<8x32xf32>
      %45 = arith.mulf %41, %arg15 : vector<8x32xf32>
      %46 = arith.mulf %40, %44 : vector<8x32xf32>
      %47 = arith.addf %45, %46 : vector<8x32xf32>
      %48 = math.tanh %47 : vector<8x32xf32>
      %49 = arith.mulf %42, %48 : vector<8x32xf32>
      %cst_34 = arith.constant dense<0.000000e+00> : vector<8x128xf32>
      %50 = tpu.matmul %49, %12, %cst_34 {dimension_numbers = #tpu.dot_dimension_numbers<[1], [0], [0], [1], [0, 0, 1, 1], [], []>} : vector<8x32xf32>, vector<32x128xf32>, vector<8x128xf32> -> vector<8x128xf32>
      %cst_35 = arith.constant dense<0.000000e+00> : vector<8x128xf32>
      %51 = tpu.matmul %arg16, %13, %cst_35 {dimension_numbers = #tpu.dot_dimension_numbers<[1], [0], [0], [1], [0, 0, 1, 1], [], []>} : vector<8x32xf32>, vector<32x128xf32>, vector<8x128xf32> -> vector<8x128xf32>
      %52 = arith.addf %50, %51 : vector<8x128xf32>
      %53 = vector.broadcast %14 : vector<1x128xf32> to vector<8x128xf32>
      %54 = arith.addf %52, %53 : vector<8x128xf32>
      %55 = vector.extract_strided_slice %54 {offsets = [0, 0], sizes = [8, 96], strides = [1, 1]} : vector<8x128xf32> to vector<8x96xf32>
      %56 = arith.negf %55 : vector<8x96xf32>
      %57 = math.exp %56 : vector<8x96xf32>
      %cst_36 = arith.constant 1.000000e+00 : f32
      %58 = vector.broadcast %cst_36 : f32 to vector<8x96xf32>
      %59 = arith.addf %58, %57 : vector<8x96xf32>
      %60 = arith.divf %58, %59 : vector<8x96xf32>
      %61 = vector.extract_strided_slice %60 {offsets = [0, 0], sizes = [8, 32], strides = [1, 1]} : vector<8x96xf32> to vector<8x32xf32>
      %62 = vector.extract_strided_slice %60 {offsets = [0, 32], sizes = [8, 32], strides = [1, 1]} : vector<8x96xf32> to vector<8x32xf32>
      %63 = vector.extract_strided_slice %60 {offsets = [0, 64], sizes = [8, 32], strides = [1, 1]} : vector<8x96xf32> to vector<8x32xf32>
      %64 = vector.extract_strided_slice %54 {offsets = [0, 96], sizes = [8, 32], strides = [1, 1]} : vector<8x128xf32> to vector<8x32xf32>
      %65 = math.tanh %64 : vector<8x32xf32>
      %66 = arith.mulf %62, %arg17 : vector<8x32xf32>
      %67 = arith.mulf %61, %65 : vector<8x32xf32>
      %68 = arith.addf %66, %67 : vector<8x32xf32>
      %69 = math.tanh %68 : vector<8x32xf32>
      %70 = arith.mulf %63, %69 : vector<8x32xf32>
      %71 = arith.index_cast %28 : i32 to index
      %c0_37 = arith.constant 0 : index
      %c0_38 = arith.constant 0 : index
      %72 = vector.load %arg12[%71, %c0_37, %c0_38] : memref<8x8x32xf32, #tpu.memory_space<vmem>>, vector<1x8x32xf32>
      %73 = vector.shape_cast %72 : vector<1x8x32xf32> to vector<8x32xf32>
      %74 = vector.shape_cast %70 : vector<8x32xf32> to vector<1x8x32xf32>
      tpu.vector_store %arg12[%71, %c0_37, %c0_38], %74 {strides = array<i32>} : memref<8x8x32xf32, #tpu.memory_space<vmem>>, vector<1x8x32xf32>,
      %c4_i32_39 = arith.constant 4 : i32
      %75 = arith.muli %arg13, %c4_i32_39 : i32
      %c1_i32_40 = arith.constant 1 : i32
      %76 = arith.addi %75, %c1_i32_40 : i32
      %77 = arith.index_cast %76 : i32 to index
      %c0_41 = arith.constant 0 : index
      %c0_42 = arith.constant 0 : index
      %78 = vector.load %arg11[%77, %c0_41, %c0_42] : memref<8x8x128xf32, #tpu.memory_space<vmem>>, vector<1x8x128xf32>
      %79 = vector.shape_cast %78 : vector<1x8x128xf32> to vector<8x128xf32>
      %cst_43 = arith.constant dense<0.000000e+00> : vector<8x128xf32>
      %80 = tpu.matmul %49, %11, %cst_43 {dimension_numbers = #tpu.dot_dimension_numbers<[1], [0], [0], [1], [0, 0, 1, 1], [], []>} : vector<8x32xf32>, vector<32x128xf32>, vector<8x128xf32> -> vector<8x128xf32>
      %81 = arith.addf %79, %80 : vector<8x128xf32>
      %82 = vector.extract_strided_slice %81 {offsets = [0, 0], sizes = [8, 96], strides = [1, 1]} : vector<8x128xf32> to vector<8x96xf32>
      %83 = arith.negf %82 : vector<8x96xf32>
      %84 = math.exp %83 : vector<8x96xf32>
      %cst_44 = arith.constant 1.000000e+00 : f32
      %85 = vector.broadcast %cst_44 : f32 to vector<8x96xf32>
      %86 = arith.addf %85, %84 : vector<8x96xf32>
      %87 = arith.divf %85, %86 : vector<8x96xf32>
      %88 = vector.extract_strided_slice %87 {offsets = [0, 0], sizes = [8, 32], strides = [1, 1]} : vector<8x96xf32> to vector<8x32xf32>
      %89 = vector.extract_strided_slice %87 {offsets = [0, 32], sizes = [8, 32], strides = [1, 1]} : vector<8x96xf32> to vector<8x32xf32>
      %90 = vector.extract_strided_slice %87 {offsets = [0, 64], sizes = [8, 32], strides = [1, 1]} : vector<8x96xf32> to vector<8x32xf32>
      %91 = vector.extract_strided_slice %81 {offsets = [0, 96], sizes = [8, 32], strides = [1, 1]} : vector<8x128xf32> to vector<8x32xf32>
      %92 = math.tanh %91 : vector<8x32xf32>
      %93 = arith.mulf %89, %47 : vector<8x32xf32>
      %94 = arith.mulf %88, %92 : vector<8x32xf32>
      %95 = arith.addf %93, %94 : vector<8x32xf32>
      %96 = math.tanh %95 : vector<8x32xf32>
      %97 = arith.mulf %90, %96 : vector<8x32xf32>
      %cst_45 = arith.constant dense<0.000000e+00> : vector<8x128xf32>
      %98 = tpu.matmul %97, %12, %cst_45 {dimension_numbers = #tpu.dot_dimension_numbers<[1], [0], [0], [1], [0, 0, 1, 1], [], []>} : vector<8x32xf32>, vector<32x128xf32>, vector<8x128xf32> -> vector<8x128xf32>
      %cst_46 = arith.constant dense<0.000000e+00> : vector<8x128xf32>
      %99 = tpu.matmul %70, %13, %cst_46 {dimension_numbers = #tpu.dot_dimension_numbers<[1], [0], [0], [1], [0, 0, 1, 1], [], []>} : vector<8x32xf32>, vector<32x128xf32>, vector<8x128xf32> -> vector<8x128xf32>
      %100 = arith.addf %98, %99 : vector<8x128xf32>
      %101 = vector.broadcast %14 : vector<1x128xf32> to vector<8x128xf32>
      %102 = arith.addf %100, %101 : vector<8x128xf32>
      %103 = vector.extract_strided_slice %102 {offsets = [0, 0], sizes = [8, 96], strides = [1, 1]} : vector<8x128xf32> to vector<8x96xf32>
      %104 = arith.negf %103 : vector<8x96xf32>
      %105 = math.exp %104 : vector<8x96xf32>
      %cst_47 = arith.constant 1.000000e+00 : f32
      %106 = vector.broadcast %cst_47 : f32 to vector<8x96xf32>
      %107 = arith.addf %106, %105 : vector<8x96xf32>
      %108 = arith.divf %106, %107 : vector<8x96xf32>
      %109 = vector.extract_strided_slice %108 {offsets = [0, 0], sizes = [8, 32], strides = [1, 1]} : vector<8x96xf32> to vector<8x32xf32>
      %110 = vector.extract_strided_slice %108 {offsets = [0, 32], sizes = [8, 32], strides = [1, 1]} : vector<8x96xf32> to vector<8x32xf32>
      %111 = vector.extract_strided_slice %108 {offsets = [0, 64], sizes = [8, 32], strides = [1, 1]} : vector<8x96xf32> to vector<8x32xf32>
      %112 = vector.extract_strided_slice %102 {offsets = [0, 96], sizes = [8, 32], strides = [1, 1]} : vector<8x128xf32> to vector<8x32xf32>
      %113 = math.tanh %112 : vector<8x32xf32>
      %114 = arith.mulf %110, %68 : vector<8x32xf32>
      %115 = arith.mulf %109, %113 : vector<8x32xf32>
      %116 = arith.addf %114, %115 : vector<8x32xf32>
      %117 = math.tanh %116 : vector<8x32xf32>
      %118 = arith.mulf %111, %117 : vector<8x32xf32>
      %119 = arith.index_cast %76 : i32 to index
      %c0_48 = arith.constant 0 : index
      %c0_49 = arith.constant 0 : index
      %120 = vector.load %arg12[%119, %c0_48, %c0_49] : memref<8x8x32xf32, #tpu.memory_space<vmem>>, vector<1x8x32xf32>
      %121 = vector.shape_cast %120 : vector<1x8x32xf32> to vector<8x32xf32>
      %122 = vector.shape_cast %118 : vector<8x32xf32> to vector<1x8x32xf32>
      tpu.vector_store %arg12[%119, %c0_48, %c0_49], %122 {strides = array<i32>} : memref<8x8x32xf32, #tpu.memory_space<vmem>>, vector<1x8x32xf32>,
      %c4_i32_50 = arith.constant 4 : i32
      %123 = arith.muli %arg13, %c4_i32_50 : i32
      %c2_i32_51 = arith.constant 2 : i32
      %124 = arith.addi %123, %c2_i32_51 : i32
      %125 = arith.index_cast %124 : i32 to index
      %c0_52 = arith.constant 0 : index
      %c0_53 = arith.constant 0 : index
      %126 = vector.load %arg11[%125, %c0_52, %c0_53] : memref<8x8x128xf32, #tpu.memory_space<vmem>>, vector<1x8x128xf32>
      %127 = vector.shape_cast %126 : vector<1x8x128xf32> to vector<8x128xf32>
      %cst_54 = arith.constant dense<0.000000e+00> : vector<8x128xf32>
      %128 = tpu.matmul %97, %11, %cst_54 {dimension_numbers = #tpu.dot_dimension_numbers<[1], [0], [0], [1], [0, 0, 1, 1], [], []>} : vector<8x32xf32>, vector<32x128xf32>, vector<8x128xf32> -> vector<8x128xf32>
      %129 = arith.addf %127, %128 : vector<8x128xf32>
      %130 = vector.extract_strided_slice %129 {offsets = [0, 0], sizes = [8, 96], strides = [1, 1]} : vector<8x128xf32> to vector<8x96xf32>
      %131 = arith.negf %130 : vector<8x96xf32>
      %132 = math.exp %131 : vector<8x96xf32>
      %cst_55 = arith.constant 1.000000e+00 : f32
      %133 = vector.broadcast %cst_55 : f32 to vector<8x96xf32>
      %134 = arith.addf %133, %132 : vector<8x96xf32>
      %135 = arith.divf %133, %134 : vector<8x96xf32>
      %136 = vector.extract_strided_slice %135 {offsets = [0, 0], sizes = [8, 32], strides = [1, 1]} : vector<8x96xf32> to vector<8x32xf32>
      %137 = vector.extract_strided_slice %135 {offsets = [0, 32], sizes = [8, 32], strides = [1, 1]} : vector<8x96xf32> to vector<8x32xf32>
      %138 = vector.extract_strided_slice %135 {offsets = [0, 64], sizes = [8, 32], strides = [1, 1]} : vector<8x96xf32> to vector<8x32xf32>
      %139 = vector.extract_strided_slice %129 {offsets = [0, 96], sizes = [8, 32], strides = [1, 1]} : vector<8x128xf32> to vector<8x32xf32>
      %140 = math.tanh %139 : vector<8x32xf32>
      %141 = arith.mulf %137, %95 : vector<8x32xf32>
      %142 = arith.mulf %136, %140 : vector<8x32xf32>
      %143 = arith.addf %141, %142 : vector<8x32xf32>
      %144 = math.tanh %143 : vector<8x32xf32>
      %145 = arith.mulf %138, %144 : vector<8x32xf32>
      %cst_56 = arith.constant dense<0.000000e+00> : vector<8x128xf32>
      %146 = tpu.matmul %145, %12, %cst_56 {dimension_numbers = #tpu.dot_dimension_numbers<[1], [0], [0], [1], [0, 0, 1, 1], [], []>} : vector<8x32xf32>, vector<32x128xf32>, vector<8x128xf32> -> vector<8x128xf32>
      %cst_57 = arith.constant dense<0.000000e+00> : vector<8x128xf32>
      %147 = tpu.matmul %118, %13, %cst_57 {dimension_numbers = #tpu.dot_dimension_numbers<[1], [0], [0], [1], [0, 0, 1, 1], [], []>} : vector<8x32xf32>, vector<32x128xf32>, vector<8x128xf32> -> vector<8x128xf32>
      %148 = arith.addf %146, %147 : vector<8x128xf32>
      %149 = vector.broadcast %14 : vector<1x128xf32> to vector<8x128xf32>
      %150 = arith.addf %148, %149 : vector<8x128xf32>
      %151 = vector.extract_strided_slice %150 {offsets = [0, 0], sizes = [8, 96], strides = [1, 1]} : vector<8x128xf32> to vector<8x96xf32>
      %152 = arith.negf %151 : vector<8x96xf32>
      %153 = math.exp %152 : vector<8x96xf32>
      %cst_58 = arith.constant 1.000000e+00 : f32
      %154 = vector.broadcast %cst_58 : f32 to vector<8x96xf32>
      %155 = arith.addf %154, %153 : vector<8x96xf32>
      %156 = arith.divf %154, %155 : vector<8x96xf32>
      %157 = vector.extract_strided_slice %156 {offsets = [0, 0], sizes = [8, 32], strides = [1, 1]} : vector<8x96xf32> to vector<8x32xf32>
      %158 = vector.extract_strided_slice %156 {offsets = [0, 32], sizes = [8, 32], strides = [1, 1]} : vector<8x96xf32> to vector<8x32xf32>
      %159 = vector.extract_strided_slice %156 {offsets = [0, 64], sizes = [8, 32], strides = [1, 1]} : vector<8x96xf32> to vector<8x32xf32>
      %160 = vector.extract_strided_slice %150 {offsets = [0, 96], sizes = [8, 32], strides = [1, 1]} : vector<8x128xf32> to vector<8x32xf32>
      %161 = math.tanh %160 : vector<8x32xf32>
      %162 = arith.mulf %158, %116 : vector<8x32xf32>
      %163 = arith.mulf %157, %161 : vector<8x32xf32>
      %164 = arith.addf %162, %163 : vector<8x32xf32>
      %165 = math.tanh %164 : vector<8x32xf32>
      %166 = arith.mulf %159, %165 : vector<8x32xf32>
      %167 = arith.index_cast %124 : i32 to index
      %c0_59 = arith.constant 0 : index
      %c0_60 = arith.constant 0 : index
      %168 = vector.load %arg12[%167, %c0_59, %c0_60] : memref<8x8x32xf32, #tpu.memory_space<vmem>>, vector<1x8x32xf32>
      %169 = vector.shape_cast %168 : vector<1x8x32xf32> to vector<8x32xf32>
      %170 = vector.shape_cast %166 : vector<8x32xf32> to vector<1x8x32xf32>
      tpu.vector_store %arg12[%167, %c0_59, %c0_60], %170 {strides = array<i32>} : memref<8x8x32xf32, #tpu.memory_space<vmem>>, vector<1x8x32xf32>,
      %c4_i32_61 = arith.constant 4 : i32
      %171 = arith.muli %arg13, %c4_i32_61 : i32
      %c3_i32 = arith.constant 3 : i32
      %172 = arith.addi %171, %c3_i32 : i32
      %173 = arith.index_cast %172 : i32 to index
      %c0_62 = arith.constant 0 : index
      %c0_63 = arith.constant 0 : index
      %174 = vector.load %arg11[%173, %c0_62, %c0_63] : memref<8x8x128xf32, #tpu.memory_space<vmem>>, vector<1x8x128xf32>
      %175 = vector.shape_cast %174 : vector<1x8x128xf32> to vector<8x128xf32>
      %cst_64 = arith.constant dense<0.000000e+00> : vector<8x128xf32>
      %176 = tpu.matmul %145, %11, %cst_64 {dimension_numbers = #tpu.dot_dimension_numbers<[1], [0], [0], [1], [0, 0, 1, 1], [], []>} : vector<8x32xf32>, vector<32x128xf32>, vector<8x128xf32> -> vector<8x128xf32>
      %177 = arith.addf %175, %176 : vector<8x128xf32>
      %178 = vector.extract_strided_slice %177 {offsets = [0, 0], sizes = [8, 96], strides = [1, 1]} : vector<8x128xf32> to vector<8x96xf32>
      %179 = arith.negf %178 : vector<8x96xf32>
      %180 = math.exp %179 : vector<8x96xf32>
      %cst_65 = arith.constant 1.000000e+00 : f32
      %181 = vector.broadcast %cst_65 : f32 to vector<8x96xf32>
      %182 = arith.addf %181, %180 : vector<8x96xf32>
      %183 = arith.divf %181, %182 : vector<8x96xf32>
      %184 = vector.extract_strided_slice %183 {offsets = [0, 0], sizes = [8, 32], strides = [1, 1]} : vector<8x96xf32> to vector<8x32xf32>
      %185 = vector.extract_strided_slice %183 {offsets = [0, 32], sizes = [8, 32], strides = [1, 1]} : vector<8x96xf32> to vector<8x32xf32>
      %186 = vector.extract_strided_slice %183 {offsets = [0, 64], sizes = [8, 32], strides = [1, 1]} : vector<8x96xf32> to vector<8x32xf32>
      %187 = vector.extract_strided_slice %177 {offsets = [0, 96], sizes = [8, 32], strides = [1, 1]} : vector<8x128xf32> to vector<8x32xf32>
      %188 = math.tanh %187 : vector<8x32xf32>
      %189 = arith.mulf %185, %143 : vector<8x32xf32>
      %190 = arith.mulf %184, %188 : vector<8x32xf32>
      %191 = arith.addf %189, %190 : vector<8x32xf32>
      %192 = math.tanh %191 : vector<8x32xf32>
      %193 = arith.mulf %186, %192 : vector<8x32xf32>
      %cst_66 = arith.constant dense<0.000000e+00> : vector<8x128xf32>
      %194 = tpu.matmul %193, %12, %cst_66 {dimension_numbers = #tpu.dot_dimension_numbers<[1], [0], [0], [1], [0, 0, 1, 1], [], []>} : vector<8x32xf32>, vector<32x128xf32>, vector<8x128xf32> -> vector<8x128xf32>
      %cst_67 = arith.constant dense<0.000000e+00> : vector<8x128xf32>
      %195 = tpu.matmul %166, %13, %cst_67 {dimension_numbers = #tpu.dot_dimension_numbers<[1], [0], [0], [1], [0, 0, 1, 1], [], []>} : vector<8x32xf32>, vector<32x128xf32>, vector<8x128xf32> -> vector<8x128xf32>
      %196 = arith.addf %194, %195 : vector<8x128xf32>
      %197 = vector.broadcast %14 : vector<1x128xf32> to vector<8x128xf32>
      %198 = arith.addf %196, %197 : vector<8x128xf32>
      %199 = vector.extract_strided_slice %198 {offsets = [0, 0], sizes = [8, 96], strides = [1, 1]} : vector<8x128xf32> to vector<8x96xf32>
      %200 = arith.negf %199 : vector<8x96xf32>
      %201 = math.exp %200 : vector<8x96xf32>
      %cst_68 = arith.constant 1.000000e+00 : f32
      %202 = vector.broadcast %cst_68 : f32 to vector<8x96xf32>
      %203 = arith.addf %202, %201 : vector<8x96xf32>
      %204 = arith.divf %202, %203 : vector<8x96xf32>
      %205 = vector.extract_strided_slice %204 {offsets = [0, 0], sizes = [8, 32], strides = [1, 1]} : vector<8x96xf32> to vector<8x32xf32>
      %206 = vector.extract_strided_slice %204 {offsets = [0, 32], sizes = [8, 32], strides = [1, 1]} : vector<8x96xf32> to vector<8x32xf32>
      %207 = vector.extract_strided_slice %204 {offsets = [0, 64], sizes = [8, 32], strides = [1, 1]} : vector<8x96xf32> to vector<8x32xf32>
      %208 = vector.extract_strided_slice %198 {offsets = [0, 96], sizes = [8, 32], strides = [1, 1]} : vector<8x128xf32> to vector<8x32xf32>
      %209 = math.tanh %208 : vector<8x32xf32>
      %210 = arith.mulf %206, %164 : vector<8x32xf32>
      %211 = arith.mulf %205, %209 : vector<8x32xf32>
      %212 = arith.addf %210, %211 : vector<8x32xf32>
      %213 = math.tanh %212 : vector<8x32xf32>
      %214 = arith.mulf %207, %213 : vector<8x32xf32>
      %215 = arith.index_cast %172 : i32 to index
      %c0_69 = arith.constant 0 : index
      %c0_70 = arith.constant 0 : index
      %216 = vector.load %arg12[%215, %c0_69, %c0_70] : memref<8x8x32xf32, #tpu.memory_space<vmem>>, vector<1x8x32xf32>
      %217 = vector.shape_cast %216 : vector<1x8x32xf32> to vector<8x32xf32>
      %218 = vector.shape_cast %214 : vector<8x32xf32> to vector<1x8x32xf32>
      tpu.vector_store %arg12[%215, %c0_69, %c0_70], %218 {strides = array<i32>} : memref<8x8x32xf32, #tpu.memory_space<vmem>>, vector<1x8x32xf32>,
      scf.yield %193, %191, %214, %212 : vector<8x32xf32>, vector<8x32xf32>, vector<8x32xf32>, vector<8x32xf32>
    }
    %c2_i32_17 = arith.constant 2 : i32
    %c0_18 = arith.constant 0 : index
    %c0_19 = arith.constant 0 : index
    %c0_20 = arith.constant 0 : index
    %18 = vector.load %arg12[%c0_18, %c0_19, %c0_20] : memref<8x8x32xf32, #tpu.memory_space<vmem>>, vector<8x8x32xf32>
    %19 = vector.shape_cast %18 : vector<8x8x32xf32> to vector<64x32xf32>
    %c0_21 = arith.constant 0 : index
    %c0_22 = arith.constant 0 : index
    %20 = vector.load %arg8[%c0_21, %c0_22] : memref<32x128xf32, #tpu.memory_space<vmem>>, vector<32x128xf32>
    %cst_23 = arith.constant dense<0.000000e+00> : vector<64x128xf32>
    %21 = tpu.matmul %19, %20, %cst_23 {dimension_numbers = #tpu.dot_dimension_numbers<[1], [0], [0], [1], [0, 0, 1, 1], [], []>} : vector<64x32xf32>, vector<32x128xf32>, vector<64x128xf32> -> vector<64x128xf32>
    %c0_24 = arith.constant 0 : index
    %c0_25 = arith.constant 0 : index
    %22 = vector.load %arg9[%c0_24, %c0_25] : memref<1x128xf32, #tpu.memory_space<vmem>>, vector<1x128xf32>
    %23 = vector.broadcast %22 : vector<1x128xf32> to vector<64x128xf32>
    %24 = arith.addf %21, %23 : vector<64x128xf32>
    %25 = vector.shape_cast %24 : vector<64x128xf32> to vector<8x8x128xf32>
    %c0_26 = arith.constant 0 : index
    %c0_27 = arith.constant 0 : index
    %c0_28 = arith.constant 0 : index
    %26 = vector.load %arg10[%c0_26, %c0_27, %c0_28] : memref<8x8x128xf32, #tpu.memory_space<vmem>>, vector<8x8x128xf32>
    tpu.vector_store %arg10[%c0_26, %c0_27, %c0_28], %25 {strides = array<i32>} : memref<8x8x128xf32, #tpu.memory_space<vmem>>, vector<8x8x128xf32>,
    return
  }
  func.func @transform_0(%arg0: i32) -> (i32, i32, i32) {
    %c0_i32 = arith.constant 0 : i32
    %c0_i32_0 = arith.constant 0 : i32
    %c0_i32_1 = arith.constant 0 : i32
    return %c0_i32, %arg0, %c0_i32_0 : i32, i32, i32
  }
  func.func @transform_1(%arg0: i32) -> (i32, i32) {
    %c0_i32 = arith.constant 0 : i32
    %c0_i32_0 = arith.constant 0 : i32
    %c0_i32_1 = arith.constant 0 : i32
    return %c0_i32, %c0_i32_0 : i32, i32
  }
  func.func @transform_2(%arg0: i32) -> (i32, i32) {
    %c0_i32 = arith.constant 0 : i32
    %c0_i32_0 = arith.constant 0 : i32
    %c0_i32_1 = arith.constant 0 : i32
    return %c0_i32, %c0_i32_0 : i32, i32
  }
  func.func @transform_3(%arg0: i32) -> (i32, i32) {
    %c0_i32 = arith.constant 0 : i32
    %c0_i32_0 = arith.constant 0 : i32
    %c0_i32_1 = arith.constant 0 : i32
    return %c0_i32, %c0_i32_0 : i32, i32
  }
  func.func @transform_4(%arg0: i32) -> (i32, i32) {
    %c0_i32 = arith.constant 0 : i32
    %c0_i32_0 = arith.constant 0 : i32
    %c0_i32_1 = arith.constant 0 : i32
    return %c0_i32, %c0_i32_0 : i32, i32
  }
  func.func @transform_5(%arg0: i32) -> (i32, i32) {
    %c0_i32 = arith.constant 0 : i32
    %c0_i32_0 = arith.constant 0 : i32
    %c0_i32_1 = arith.constant 0 : i32
    return %c0_i32, %c0_i32_0 : i32, i32
  }
  func.func @transform_6(%arg0: i32) -> (i32, i32) {
    %c0_i32 = arith.constant 0 : i32
    %c0_i32_0 = arith.constant 0 : i32
    %c0_i32_1 = arith.constant 0 : i32
    return %c0_i32, %c0_i32_0 : i32, i32
  }
  func.func @transform_7(%arg0: i32) -> (i32, i32) {
    %c0_i32 = arith.constant 0 : i32
    %c0_i32_0 = arith.constant 0 : i32
    %c0_i32_1 = arith.constant 0 : i32
    return %c0_i32, %c0_i32_0 : i32, i32
  }
  func.func @transform_8(%arg0: i32) -> (i32, i32) {
    %c0_i32 = arith.constant 0 : i32
    %c0_i32_0 = arith.constant 0 : i32
    %c0_i32_1 = arith.constant 0 : i32
    return %c0_i32, %c0_i32_0 : i32, i32
  }
  func.func @transform_9(%arg0: i32) -> (i32, i32, i32) {
    %c0_i32 = arith.constant 0 : i32
    %c0_i32_0 = arith.constant 0 : i32
    %c0_i32_1 = arith.constant 0 : i32
    return %c0_i32, %arg0, %c0_i32_0 : i32, i32, i32
  }
}

</mosaic_0001>

<bundles_post_ra>
// kernel: tpu_custom_call.1
= control target key start
LH: loop header
LB: loop body
LE: loop exit
PB: predicated region body
PF: predicated region fallthrough
CT: control target
= control target key end

     0   :  { %14 = vsyncpa [#allocation5], 0  ;;  %s1603_s0 = inlined_call_operand.vmem [shape: f32[8,8,1], index: 0, kind: input, shape index: {}]   ;;  %s1604_s1 = inlined_call_operand.vmem [shape: f32[1,128], index: 1, kind: input, shape index: {}]   ;;  %s1605_s2 = inlined_call_operand.vmem [shape: f32[32,128], index: 2, kind: input, shape index: {}]   ;;  %s1606_s3 = inlined_call_operand.vmem [shape: f32[1,128], index: 3, kind: input, shape index: {}]   ;;  %s1607_s4 = inlined_call_operand.vmem [shape: f32[32,128], index: 4, kind: input, shape index: {}]   ;;  %s1608_s5 = inlined_call_operand.hbm [shape: f32[32,128], index: 5, kind: input, shape index: {}]   ;;  %s1609_s6 = inlined_call_operand.vmem [shape: f32[1,128], index: 6, kind: input, shape index: {}]   ;;  %s1610_s7 = inlined_call_operand.hbm [shape: f32[32,128], index: 7, kind: input, shape index: {}]   ;;  %s1611_s8 = inlined_call_operand.vmem [shape: f32[1,128], index: 8, kind: input, shape index: {}]   ;;  %s1612_s9 = inlined_call_operand.hbm [shape: f32[8,8,128], index: 9, kind: output, shape index: {}]  }
   0x1   :  { %15 = vsyncpa [#allocation8], 0 }
   0x2   :  { %16 = vsyncpa [#allocation6], 0  ;;  %s31_s11 = sshll.u32 %s1608_s5, 4  ;;  %s1250_s12 = smov [#allocation4]   ;;  %s32_s11 = int_to_ptr.hbm [resolvable:$true] %s31_s11 }
   0x3   :  { %s33_s13 = sshll.u32 %s1250_s12, 4  ;;  %s46_s16 = sshll.u32 %s1610_s7, 4  ;;  %s34_s13 = int_to_ptr.vmem [resolvable:$true] %s33_s13  ;;  %s47_s16 = int_to_ptr.hbm [resolvable:$true] %s46_s16 }
   0x4   :  { %s1251_s17 = smov 128   ;;  %s1252_s18 = smov 8  }
   0x5   :  { %39 = dma.hbm_to_vmem [thread:$0]  %s32_s11, 512, %s34_s13, [#allocation5], %s1251_s17, %s1251_s17, %s1252_s18  }
   0x6   :  { %s1253_s19 = smov [#allocation7]  }
   0x7   :  { %s48_s20 = sshll.u32 %s1253_s19, 4  ;;  %s49_s20 = int_to_ptr.vmem [resolvable:$true] %s48_s20 }
   0x8   :  { %54 = dma.hbm_to_vmem [thread:$0]  %s47_s16, 512, %s49_s20, [#allocation8], %s1251_s17, %s1251_s17, %s1252_s18  }
   0x9   :  { %1224 = dma.done.wait [#allocation5], 512  }
   0xa   :  { %1225 = vsyncadd [#allocation5], 4294966784 }
   0xb   :  { %1226 = dma.done.wait [#allocation8], 512  }
   0xc   :  { %1227 = vsyncadd [#allocation8], 4294966784  ;;  %v1254_v0 = vmov 0   ;;  %v1323_v1 = vld [vmem:[%s1605_s2] sm:$0xff]  ;;  %v1328_v2 = vld [vmem:[%s1605_s2 + $0x8] sm:$0xff]  ;;  %v1403_v48 = vmov 0.0  }
   0xd   :  { %1063 = vset.pattern.permute.xlu1 %v1254_v0  ;;  %1062 = vset.pattern.permute.xlu0 %v1254_v0  ;;  %v1333_v3 = vld [vmem:[%s1605_s2 + $0x10] sm:$0xff]  ;;  %v1338_v4 = vld [vmem:[%s1605_s2 + $0x18] sm:$0xff]  ;;  %v1343_v5 = vld [vmem:[%s1607_s4] sm:$0xff]  ;;  %v1405_v49 = vmov 0.0   ;;  %v1407_v50 = vmov 0.0   ;;  %v1409_v51 = vmov 0.0  }
   0xe   :  { %1064 = vset.pattern.permute.xlu2 %v1254_v0  ;;  %v1348_v6 = vld [vmem:[%s1607_s4 + $0x8] sm:$0xff]  ;;  %v1353_v7 = vld [vmem:[%s1607_s4 + $0x10] sm:$0xff]  ;;  %v1358_v8 = vld [vmem:[%s1607_s4 + $0x18] sm:$0xff] }
   0xf   :  { %v1360_v9 = vld [vmem:[#allocation4] sm:$0xff]  ;;  %v1362_v10 = vld [vmem:[#allocation4 + $0x8] sm:$0xff]  ;;  %v1364_v11 = vld [vmem:[#allocation4 + $0x10] sm:$0xff] }
  0x10   :  { %v1366_v12 = vld [vmem:[#allocation4 + $0x18] sm:$0xff]  ;;  %v1371_v13 = vld [vmem:[%s1609_s6] sm:$0x1]  ;;  %v67_v14 = vld [vmem:[%s1603_s0 + $0x10] sm:$0xff] }
  0x11   :  { %v65_v15 = vld [vmem:[%s1603_s0] sm:$0xff]  ;;  %86 = vperm.xlu1 %1063, %v67_v14   ;;  %v68_v17 = vld [vmem:[%s1603_s0 + $0x18] sm:$0xff]  ;;  %v66_v18 = vld [vmem:[%s1603_s0 + $0x8] sm:$0xff] }
  0x12   :  { %76 = vperm.xlu0 %1062, %v65_v15   ;;  %v69_v16 = vld [vmem:[%s1603_s0 + $0x20] sm:$0xff]  ;;  %v70_v19 = vld [vmem:[%s1603_s0 + $0x28] sm:$0xff]  ;;  %v72_v20 = vld [vmem:[%s1603_s0 + $0x38] sm:$0xff] }
  0x13   :  { %96 = vperm.xlu2 %1064, %v69_v16   ;;  %v71_v21 = vld [vmem:[%s1603_s0 + $0x30] sm:$0xff]  ;;  %v1065_v22 = vld [vmem:[%s1604_s1] ss:$0 sm:$0xff]  ;;  %s1411_s0 = smov 0  }
  0x14   :  { %v1066_v24 = vld [vmem:[%s1606_s3] ss:$0 sm:$0xff] }
  0x19   :  { %91 = vperm.xlu1 %1063, %v68_v17  }
  0x1a   :  { %81 = vperm.xlu0 %1062, %v66_v18  }
  0x1b   :  { %101 = vperm.xlu2 %1064, %v70_v19  }
  0x21   :  { %111 = vperm.xlu1 %1063, %v72_v20  }
  0x22   :  { %106 = vperm.xlu0 %1062, %v71_v21  }
  0x6d   :  { %v97_v23 = vpop.permute.xlu2 %96 }
  0x6e   :  { %v121_v25 = vmul.f32 %v1065_v22, %v97_v23 }
  0x70   :  { %v133_v26 = vadd.f32 %v1066_v24, %v121_v25 }
  0x72   :  { %141 = vst [vmem:[#allocation2 + $0x20] sm:$0xff] %v133_v26 }
  0x75   :  { %v102_v27 = vpop.permute.xlu2 %101 }
  0x76   :  { %v122_v28 = vmul.f32 %v1065_v22, %v102_v27 }
  0x78   :  { %v134_v29 = vadd.f32 %v1066_v24, %v122_v28 }
  0x7a   :  { %142 = vst [vmem:[#allocation2 + $0x28] sm:$0xff] %v134_v29 }
  0x83   :  { %v87_v30 = vpop.permute.xlu1 %86 }
  0x84   :  { %v77_v31 = vpop.permute.xlu0 %76  ;;  %v119_v32 = vmul.f32 %v1065_v22, %v87_v30 }
  0x85   :  { %v117_v33 = vmul.f32 %v1065_v22, %v77_v31 }
  0x86   :  { %v131_v34 = vadd.f32 %v1066_v24, %v119_v32 }
  0x87   :  { %v129_v35 = vadd.f32 %v1066_v24, %v117_v33 }
  0x88   :  { %139 = vst [vmem:[#allocation2 + $0x10] sm:$0xff] %v131_v34 }
  0x89   :  { %137 = vst [vmem:[#allocation2] sm:$0xff] %v129_v35 }
  0x8b   :  { %v92_v36 = vpop.permute.xlu1 %91 }
  0x8c   :  { %v82_v37 = vpop.permute.xlu0 %81  ;;  %v120_v38 = vmul.f32 %v1065_v22, %v92_v36 }
  0x8d   :  { %v118_v39 = vmul.f32 %v1065_v22, %v82_v37 }
  0x8e   :  { %v132_v40 = vadd.f32 %v1066_v24, %v120_v38 }
  0x8f   :  { %v130_v41 = vadd.f32 %v1066_v24, %v118_v39 }
  0x90   :  { %140 = vst [vmem:[#allocation2 + $0x18] sm:$0xff] %v132_v40 }
  0x91   :  { %138 = vst [vmem:[#allocation2 + $0x8] sm:$0xff] %v130_v41 }
  0x93   :  { %v112_v42 = vpop.permute.xlu1 %111 }
  0x94   :  { %v107_v43 = vpop.permute.xlu0 %106  ;;  %v124_v44 = vmul.f32 %v1065_v22, %v112_v42 }
  0x95   :  { %v123_v45 = vmul.f32 %v1065_v22, %v107_v43 }
  0x96   :  { %v136_v46 = vadd.f32 %v1066_v24, %v124_v44 }
  0x97   :  { %v135_v47 = vadd.f32 %v1066_v24, %v123_v45 }
  0x98   :  { %144 = vst [vmem:[#allocation2 + $0x38] sm:$0xff] %v136_v46 }
  0x99   :  { %143 = vst [vmem:[#allocation2 + $0x30] sm:$0xff] %v135_v47 }
  0x9a LB: > { %190 = vmatpush.msra.mxu0 %v1338_v4  ;;  %278 = vmatpush.msra.mxu2 %v1358_v8  ;;  %s1255_s1 = smov 64   ;;  %vm175_vm0 = vcmask 261120   ;;  %s995_s3 = sshll.u32 %s1248_s0, 5  ;;  %v1497_v32 = vperm.slane %v1371_v13, 0  ;;  %s1248_s0 = sphi %s1411_s0, %s163_s0   ;;  %v1244_v51 = vphi %v1409_v51, %v700_v51   ;;  %v1240_v50 = vphi %v1407_v50, %v1555_v50   ;;  %v1236_v49 = vphi %v1405_v49, %v785_v49   ;;  %v1232_v48 = vphi %v1403_v48, %v779_v48  }
  0x9b   : > { %349 = vmatpush.msra.mxu3 %v1338_v4  ;;  %253 = vmatpush.msra.mxu1 %v1366_v12  ;;  %s1467_s12 = scalar_lea.vmem [#allocation2], %s995_s3  ;;  %s1256_s13 = smov 32  }
  0x9c   : > { %173 = vrot.lane.b32.xlu0 %v1244_v51, %s1255_s1  ;;  %191 = vmatpush.msra.mxu0 %v1333_v3  ;;  %s1520_s2 = scalar_lea.vmem [#allocation3], %s995_s3  ;;  %s163_s0 = sadd.s32 1, %s1248_s0  }
  0x9d   : > { %279 = vmatpush.msra.mxu2 %v1353_v7  ;;  %350 = vmatpush.msra.mxu3 %v1333_v3  ;;  %p160_p0 = scmp.ge.s32.totalorder %s163_s0, 2  }
  0x9e   : > { %192 = vmatpush.msra.mxu0 %v1328_v2  ;;  %254 = vmatpush.msra.mxu1 %v1364_v11  ;;  %s1257_s16 = smov (%p160_p0), [#allocation9]   ;;  %s888_s20 = sshll.u32 (%p160_p0), %s1612_s9, 4  ;;  %s889_s20 = int_to_ptr.hbm [resolvable:$true] %s888_s20 }
  0x9f   : > { %280 = vmatpush.msra.mxu2 %v1348_v6  ;;  %351 = vmatpush.msra.mxu3 %v1328_v2  ;;  %s886_s19 = sshll.u32 (%p160_p0), %s1257_s16, 4  ;;  %s887_s19 = int_to_ptr.vmem [resolvable:$true] %s886_s19 }
  0xa0   : > { %193 = vmatpush.msra.mxu0 %v1323_v1  ;;  %255 = vmatpush.msra.mxu1 %v1362_v10  ;;  %v171_v53 = vld [vmem:[%s1467_s12] sm:$0xff]  ;;  %v956_v29 = vld [vmem:[%s1467_s12 + $0x8] sm:$0xff] }
  0xa1   : > { %281 = vmatpush.msra.mxu2 %v1343_v5  ;;  %352 = vmatpush.msra.mxu3 %v1323_v1 }
  0xa2   : > { %256 = vmatpush.msra.mxu1 %v1360_v9  ;;  %409 = vmatpush.msrb.mxu0 %v1366_v12 }
  0xa3   : > { %502 = vmatpush.msrb.mxu2 %v1338_v4  ;;  %562 = vmatpush.msrb.mxu3 %v1366_v12 }
  0xa4   : > { %434 = vmatpush.msrb.mxu1 %v1358_v8  ;;  %410 = vmatpush.msrb.mxu0 %v1364_v11 }
  0xa5   : > { %503 = vmatpush.msrb.mxu2 %v1333_v3  ;;  %563 = vmatpush.msrb.mxu3 %v1364_v11 }
  0xa6   : > { %435 = vmatpush.msrb.mxu1 %v1353_v7  ;;  %411 = vmatpush.msrb.mxu0 %v1362_v10 }
  0xa7   : > { %504 = vmatpush.msrb.mxu2 %v1328_v2  ;;  %564 = vmatpush.msrb.mxu3 %v1362_v10 }
  0xa8   : > { %436 = vmatpush.msrb.mxu1 %v1348_v6  ;;  %412 = vmatpush.msrb.mxu0 %v1360_v9 }
  0xa9   : > { %505 = vmatpush.msrb.mxu2 %v1323_v1  ;;  %565 = vmatpush.msrb.mxu3 %v1360_v9 }
  0xaa   : > { %437 = vmatpush.msrb.mxu1 %v1343_v5 }
 0x10e   : > { %v174_v52 = vpop.permute.xlu0 %173 }
 0x10f   : > { %949 = vmatmul.msk.f32.vlgmr.msra.gmra.mxu0 %vm175_vm0, %v174_v52 }
 0x110   : > { %587 = vmatpush.msra.mxu0 %v1358_v8 }
 0x112   : > { %588 = vmatpush.msra.mxu0 %v1353_v7 }
 0x114   : > { %589 = vmatpush.msra.mxu0 %v1348_v6 }
 0x116   : > { %590 = vmatpush.msra.mxu0 %v1343_v5 }
 0x18c   : > { %v195_v54 = vpop.f32.mrf.mxu0 }
 0x18d   : > { %v198_v55 = vadd.f32 %v195_v54, %v171_v53 }
 0x18f   : > { %1067 = vtanh.f32 %v198_v55  ;;  %v950_v57 = vmul.f32 -1.442695, %v198_v55 }
 0x191   : > { %1069 = vpow2.f32 %v950_v57 }
 0x195   : > { %v1068_v56 = vpop.eup %1067 }
 0x196   : > { %221 = vrot.lane.b32.xlu0 %v1068_v56, %s1256_s13 }
 0x197   : > { %v1070_v58 = vpop.eup %1069 }
 0x198   : > { %v202_v59 = vadd.f32 1.0, %v1070_v58 }
 0x19a   : > { %1071 = vrcp.f32 %v202_v59  ;;  %v214_v14 = vand.u32 2147483648, %v202_v59  ;;  %vm208_vm2 = vweird.f32 %v202_v59  ;;  %v212_v15 = vand.u32 2147483647, %v202_v59 }
 0x19c   : > { %v215_v17 = vor.u32 1.1754944e-38, %v214_v14  ;;  %vm213_vm4 = vcmp.eq.f32.partialorder %v212_v15, 8.507059e+37 }
 0x1a0   : > { %v1072_v60 = vpop.eup %1071 }
 0x1a1   : > { %v204_v61 = vmul.f32 %v1072_v60, %v202_v59  ;;  %vm209_vm1 = vweird.f32 %v1072_v60 }
 0x1a2   : > { %vm210_vm3 = vmor %vm208_vm2, %vm209_vm1 }
 0x1a3   : > { %v205_v62 = vsub.f32 1.0, %v204_v61 }
 0x1a5   : > { %v206_v63 = vmul.f32 %v1072_v60, %v205_v62 }
 0x1a7   : > { %v207_v0 = vadd.f32 %v1072_v60, %v206_v63 }
 0x1a9   : > { %v211_v16 = vsel %vm210_vm3, %v1072_v60, %v207_v0 }
 0x1aa   : > { %v216_v19 = vsel %vm213_vm4, %v215_v17, %v211_v16 }
 0x1ab   : > { %v219_v21 = vmul.f32 %v1240_v50, %v216_v19 }
 0x208   : > { %v222_v18 = vpop.permute.xlu0 %221 }
 0x209   : > { %v224_v20 = vmul.f32 %v222_v18, %v216_v19 }
 0x20b   : > { %226 = vrot.lane.b32.xlu1 %v224_v20, %s1256_s13 }
 0x27d   : > { %v227_v22 = vpop.permute.xlu1 %226 }
 0x27e   : > { %v1473_v23 = vadd.f32 %v227_v22, %v219_v21 }
 0x280   : > { %1073 = vtanh.f32 %v1473_v23 }
 0x286   : > { %v1074_v24 = vpop.eup %1073 }
 0x287   : > { %232 = vrot.lane.b32.xlu1 %v1074_v24, %s1256_s13 }
 0x2f9   : > { %v233_v25 = vpop.permute.xlu1 %232 }
 0x2fa   : > { %v235_v26 = vmul.f32 %v233_v25, %v216_v19 }
 0x2fc   : > { %262 = vrot.lane.b32.xlu2 %v235_v26, %s1255_s1 }
 0x304   : > { %237 = vrot.lane.b32.xlu2 %v1236_v49, %s1255_s1 }
 0x356   : > { %v263_v27 = vpop.permute.xlu2 %262 }
 0x357   : > { %952 = vmatmul.msk.f32.vlgmr.msra.gmra.mxu2 %vm175_vm0, %v263_v27  ;;  %957 = vmatmul.msk.f32.vlgmr.msra.gmra.mxu3 %vm175_vm0, %v263_v27 }
 0x358   : > { %740 = vmatpush.msra.mxu3 %v1358_v8  ;;  %715 = vmatpush.msra.mxu2 %v1366_v12 }
 0x35a   : > { %741 = vmatpush.msra.mxu3 %v1353_v7  ;;  %716 = vmatpush.msra.mxu2 %v1364_v11  ;;  %v1131_v7 = vld [vmem:[%s1611_s8] ss:$0 sm:$0xff] (%p160_p0) }
 0x35c   : > { %742 = vmatpush.msra.mxu3 %v1348_v6  ;;  %717 = vmatpush.msra.mxu2 %v1362_v10 }
 0x35e   : > { %v238_v28 = vpop.permute.xlu2 %237  ;;  %743 = vmatpush.msra.mxu3 %v1343_v5  ;;  %718 = vmatpush.msra.mxu2 %v1360_v9 }
 0x35f   : > { %951 = vmatmul.msk.f32.vlgmr.msra.gmra.mxu1 %vm175_vm0, %v238_v28 }
 0x360   : > { %655 = vmatpush.msra.mxu1 %v1338_v4 }
 0x362   : > { %656 = vmatpush.msra.mxu1 %v1333_v3 }
 0x364   : > { %657 = vmatpush.msra.mxu1 %v1328_v2 }
 0x366   : > { %658 = vmatpush.msra.mxu1 %v1323_v1 }
 0x3da   : > { %v354_v30 = vpop.f32.mrf.mxu3  ;;  %v283_v33 = vpop.f32.mrf.mxu2 }
 0x3db   : > { %v357_v31 = vadd.f32 %v956_v29, %v354_v30 }
 0x3dc   : > { %v258_v34 = vpop.f32.mrf.mxu1 }
 0x3dd   : > { %1075 = vtanh.f32 %v357_v31  ;;  %v284_v35 = vadd.f32 %v283_v33, %v258_v34  ;;  %v958_v39 = vmul.f32 -1.442695, %v357_v31 }
 0x3df   : > { %v289_v36 = vadd.f32 %v1497_v32, %v284_v35  ;;  %v967_v35 = vld [vmem:[%s1467_s12 + $0x10] sm:$0xff] }
 0x3e1   : > { %1077 = vtanh.f32 %v289_v36  ;;  %v953_v40 = vmul.f32 -1.442695, %v289_v36 }
 0x3e2   : > { %1079 = vpow2.f32 %v958_v39 }
 0x3e3   : > { %v1076_v37 = vpop.eup %1075  ;;  %1081 = vpow2.f32 %v953_v40 }
 0x3e4   : > { %380 = vrot.lane.b32.xlu1 %v1076_v37, %s1256_s13 }
 0x3e7   : > { %v1078_v38 = vpop.eup %1077 }
 0x3e8   : > { %312 = vrot.lane.b32.xlu0 %v1078_v38, %s1256_s13  ;;  %v1080_v41 = vpop.eup %1079 }
 0x3e9   : > { %v361_v42 = vadd.f32 1.0, %v1080_v41  ;;  %v1082_v43 = vpop.eup %1081 }
 0x3ea   : > { %v293_v44 = vadd.f32 1.0, %v1082_v43 }
 0x3eb   : > { %1083 = vrcp.f32 %v361_v42  ;;  %v373_v55 = vand.u32 2147483648, %v361_v42  ;;  %vm367_vm6 = vweird.f32 %v361_v42  ;;  %v371_v56 = vand.u32 2147483647, %v361_v42 }
 0x3ec   : > { %1085 = vrcp.f32 %v293_v44  ;;  %v305_v60 = vand.u32 2147483648, %v293_v44  ;;  %vm299_vm10 = vweird.f32 %v293_v44  ;;  %v303_v61 = vand.u32 2147483647, %v293_v44 }
 0x3ed   : > { %v374_v59 = vor.u32 1.1754944e-38, %v373_v55  ;;  %vm372_vm9 = vcmp.eq.f32.partialorder %v371_v56, 8.507059e+37 }
 0x3ee   : > { %v306_v15 = vor.u32 1.1754944e-38, %v305_v60  ;;  %vm304_vm12 = vcmp.eq.f32.partialorder %v303_v61, 8.507059e+37 }
 0x3f1   : > { %v1084_v45 = vpop.eup %1083 }
 0x3f2   : > { %v363_v46 = vmul.f32 %v1084_v45, %v361_v42  ;;  %v1086_v47 = vpop.eup %1085  ;;  %vm368_vm5 = vweird.f32 %v1084_v45 }
 0x3f3   : > { %v295_v50 = vmul.f32 %v1086_v47, %v293_v44  ;;  %vm369_vm7 = vmor %vm367_vm6, %vm368_vm5  ;;  %vm300_vm8 = vweird.f32 %v1086_v47 }
 0x3f4   : > { %v364_v49 = vsub.f32 1.0, %v363_v46  ;;  %vm301_vm11 = vmor %vm299_vm10, %vm300_vm8 }
 0x3f5   : > { %v296_v52 = vsub.f32 1.0, %v295_v50 }
 0x3f6   : > { %v365_v51 = vmul.f32 %v1084_v45, %v364_v49 }
 0x3f7   : > { %v297_v54 = vmul.f32 %v1086_v47, %v296_v52 }
 0x3f8   : > { %v366_v53 = vadd.f32 %v1084_v45, %v365_v51 }
 0x3f9   : > { %v298_v58 = vadd.f32 %v1086_v47, %v297_v54 }
 0x3fa   : > { %v370_v57 = vsel %vm369_vm7, %v1084_v45, %v366_v53 }
 0x3fb   : > { %v375_v63 = vsel %vm372_vm9, %v374_v59, %v370_v57  ;;  %v302_v14 = vsel %vm301_vm11, %v1086_v47, %v298_v58 }
 0x3fc   : > { %v307_v17 = vsel %vm304_vm12, %v306_v15, %v302_v14  ;;  %v378_v24 = vmul.f32 %v375_v63, %v1473_v23 }
 0x3fd   : > { %v310_v19 = vmul.f32 %v1232_v48, %v307_v17 }
 0x456   : > { %v381_v62 = vpop.permute.xlu1 %380 }
 0x457   : > { %v383_v0 = vmul.f32 %v381_v62, %v375_v63 }
 0x459   : > { %385 = vrot.lane.b32.xlu0 %v383_v0, %s1256_s13 }
 0x45a   : > { %v313_v16 = vpop.permute.xlu0 %312 }
 0x45b   : > { %v315_v18 = vmul.f32 %v313_v16, %v307_v17 }
 0x45d   : > { %317 = vrot.lane.b32.xlu2 %v315_v18, %s1256_s13 }
 0x4b7   : > { %v318_v20 = vpop.permute.xlu2 %317 }
 0x4b8   : > { %v1505_v21 = vadd.f32 %v318_v20, %v310_v19 }
 0x4ba   : > { %1087 = vtanh.f32 %v1505_v21 }
 0x4c0   : > { %v1088_v22 = vpop.eup %1087 }
 0x4c1   : > { %323 = vrot.lane.b32.xlu1 %v1088_v22, %s1256_s13 }
 0x4cb   : > { %v386_v25 = vpop.permute.xlu0 %385 }
 0x4cc   : > { %v1510_v26 = vadd.f32 %v386_v25, %v378_v24 }
 0x4ce   : > { %1089 = vtanh.f32 %v1510_v26 }
 0x4d4   : > { %v1090_v27 = vpop.eup %1089 }
 0x4d5   : > { %391 = vrot.lane.b32.xlu2 %v1090_v27, %s1256_s13 }
 0x52f   : > { %v392_v48 = vpop.permute.xlu2 %391 }
 0x530   : > { %v394_v28 = vmul.f32 %v392_v48, %v375_v63 }
 0x532   : > { %418 = vrot.lane.b32.xlu1 %v394_v28, %s1255_s1 }
 0x533   : > { %v324_v29 = vpop.permute.xlu1 %323 }
 0x534   : > { %v326_v30 = vmul.f32 %v324_v29, %v307_v17 }
 0x536   : > { %328 = vrot.lane.b32.xlu0 %v326_v30, %s1255_s1 }
 0x5a4   : > { %v419_v31 = vpop.permute.xlu1 %418 }
 0x5a5   : > { %960 = vmatmul.msk.f32.vlgmr.msrb.gmra.mxu1 %vm175_vm0, %v419_v31  ;;  %968 = vmatmul.msk.f32.vlgmr.msrb.gmra.mxu2 %vm175_vm0, %v419_v31 }
 0x5a8   : > { %v329_v23 = vpop.permute.xlu0 %328 }
 0x5a9   : > { %332 = vst.msk [vmem:[%s1520_s2] sm:$0xff] %vm175_vm0, %v329_v23  ;;  %959 = vmatmul.msk.f32.vlgmr.msrb.gmra.mxu0 %vm175_vm0, %v329_v23 }
 0x622   : > { %v439_v33 = vpop.f32.mrf.mxu1 }
 0x626   : > { %v414_v34 = vpop.f32.mrf.mxu0 }
 0x627   : > { %v440_v36 = vadd.f32 %v439_v33, %v414_v34 }
 0x628   : > { %v507_v37 = vpop.f32.mrf.mxu2 }
 0x629   : > { %v442_v38 = vadd.f32 %v440_v36, %v1497_v32  ;;  %v510_v39 = vadd.f32 %v967_v35, %v507_v37  ;;  %v978_v36 = vld [vmem:[%s1467_s12 + $0x18] sm:$0xff] }
 0x62b   : > { %1091 = vtanh.f32 %v442_v38  ;;  %v961_v42 = vmul.f32 -1.442695, %v442_v38  ;;  %v969_v46 = vmul.f32 -1.442695, %v510_v39 }
 0x62c   : > { %1093 = vtanh.f32 %v510_v39 }
 0x62d   : > { %1095 = vpow2.f32 %v961_v42 }
 0x631   : > { %v1092_v40 = vpop.eup %1091 }
 0x632   : > { %v1094_v41 = vpop.eup %1093  ;;  %465 = vrot.lane.b32.xlu2 %v1092_v40, %s1256_s13 }
 0x633   : > { %533 = vrot.lane.b32.xlu0 %v1094_v41, %s1256_s13  ;;  %v1096_v43 = vpop.eup %1095 }
 0x634   : > { %v446_v44 = vadd.f32 1.0, %v1096_v43 }
 0x636   : > { %1097 = vrcp.f32 %v446_v44  ;;  %v458_v54 = vand.u32 2147483648, %v446_v44  ;;  %vm452_vm14 = vweird.f32 %v446_v44  ;;  %v456_v55 = vand.u32 2147483647, %v446_v44 }
 0x637   : > { %1099 = vpow2.f32 %v969_v46 }
 0x638   : > { %v459_v57 = vor.u32 1.1754944e-38, %v458_v54  ;;  %vm457_vm1 = vcmp.eq.f32.partialorder %v456_v55, 8.507059e+37 }
 0x63c   : > { %v1098_v45 = vpop.eup %1097 }
 0x63d   : > { %v448_v47 = vmul.f32 %v1098_v45, %v446_v44  ;;  %v1100_v51 = vpop.eup %1099  ;;  %vm453_vm13 = vweird.f32 %v1098_v45 }
 0x63e   : > { %v514_v52 = vadd.f32 1.0, %v1100_v51  ;;  %vm454_vm15 = vmor %vm452_vm14, %vm453_vm13 }
 0x63f   : > { %v449_v49 = vsub.f32 1.0, %v448_v47 }
 0x640   : > { %1101 = vrcp.f32 %v514_v52  ;;  %v526_v15 = vand.u32 2147483648, %v514_v52  ;;  %vm520_vm3 = vweird.f32 %v514_v52  ;;  %v524_v16 = vand.u32 2147483647, %v514_v52 }
 0x641   : > { %v450_v50 = vmul.f32 %v1098_v45, %v449_v49 }
 0x642   : > { %v527_v18 = vor.u32 1.1754944e-38, %v526_v15  ;;  %vm525_vm5 = vcmp.eq.f32.partialorder %v524_v16, 8.507059e+37 }
 0x643   : > { %v451_v53 = vadd.f32 %v1098_v45, %v450_v50 }
 0x645   : > { %v455_v56 = vsel %vm454_vm15, %v1098_v45, %v451_v53 }
 0x646   : > { %v460_v59 = vsel %vm457_vm1, %v459_v57, %v455_v56  ;;  %v1102_v61 = vpop.eup %1101 }
 0x647   : > { %v516_v62 = vmul.f32 %v1102_v61, %v514_v52  ;;  %vm521_vm2 = vweird.f32 %v1102_v61  ;;  %v463_v24 = vmul.f32 %v460_v59, %v1505_v21 }
 0x648   : > { %vm522_vm4 = vmor %vm520_vm3, %vm521_vm2 }
 0x649   : > { %v517_v63 = vsub.f32 1.0, %v516_v62 }
 0x64b   : > { %v518_v0 = vmul.f32 %v1102_v61, %v517_v63 }
 0x64d   : > { %v519_v14 = vadd.f32 %v1102_v61, %v518_v0 }
 0x64f   : > { %v523_v17 = vsel %vm522_vm4, %v1102_v61, %v519_v14 }
 0x650   : > { %v528_v20 = vsel %vm525_vm5, %v527_v18, %v523_v17 }
 0x651   : > { %v531_v25 = vmul.f32 %v528_v20, %v1510_v26 }
 0x68c   : > { %v466_v58 = vpop.permute.xlu2 %465 }
 0x68d   : > { %v468_v60 = vmul.f32 %v466_v58, %v460_v59 }
 0x68f   : > { %470 = vrot.lane.b32.xlu1 %v468_v60, %s1256_s13 }
 0x6a5   : > { %v534_v19 = vpop.permute.xlu0 %533 }
 0x6a6   : > { %v536_v22 = vmul.f32 %v534_v19, %v528_v20 }
 0x6a8   : > { %538 = vrot.lane.b32.xlu2 %v536_v22, %s1256_s13 }
 0x701   : > { %v471_v27 = vpop.permute.xlu1 %470 }
 0x702   : > { %v539_v48 = vpop.permute.xlu2 %538  ;;  %v1533_v28 = vadd.f32 %v471_v27, %v463_v24 }
 0x703   : > { %v1535_v29 = vadd.f32 %v539_v48, %v531_v25 }
 0x704   : > { %1103 = vtanh.f32 %v1533_v28 }
 0x705   : > { %1105 = vtanh.f32 %v1535_v29 }
 0x70a   : > { %v1104_v30 = vpop.eup %1103 }
 0x70b   : > { %v1106_v31 = vpop.eup %1105  ;;  %476 = vrot.lane.b32.xlu0 %v1104_v30, %s1256_s13 }
 0x70c   : > { %544 = vrot.lane.b32.xlu1 %v1106_v31, %s1256_s13 }
 0x77d   : > { %v477_v21 = vpop.permute.xlu0 %476 }
 0x77e   : > { %v545_v26 = vpop.permute.xlu1 %544  ;;  %v479_v23 = vmul.f32 %v477_v21, %v460_v59 }
 0x77f   : > { %v547_v33 = vmul.f32 %v545_v26, %v528_v20 }
 0x780   : > { %481 = vrot.lane.b32.xlu2 %v479_v23, %s1255_s1 }
 0x781   : > { %571 = vrot.lane.b32.xlu0 %v547_v33, %s1255_s1 }
 0x7da   : > { %v482_v34 = vpop.permute.xlu2 %481 }
 0x7db   : > { %964 = vst.msk [vmem:[%s1520_s2 + $0x8] sm:$0xff] %vm175_vm0, %v482_v34  ;;  %970 = vmatmul.msk.f32.vlgmr.msrb.gmra.mxu3 %vm175_vm0, %v482_v34 }
 0x7f3   : > { %v572_v35 = vpop.permute.xlu0 %571 }
 0x7f4   : > { %971 = vmatmul.msk.f32.vlgmr.msra.gmra.mxu0 %vm175_vm0, %v572_v35  ;;  %979 = vmatmul.msk.f32.vlgmr.msra.gmra.mxu1 %vm175_vm0, %v572_v35 }
 0x85e   : > { %v567_v37 = vpop.f32.mrf.mxu3 }
 0x871   : > { %v592_v38 = vpop.f32.mrf.mxu0  ;;  %v660_v39 = vpop.f32.mrf.mxu1 }
 0x872   : > { %v593_v40 = vadd.f32 %v592_v38, %v567_v37  ;;  %v663_v41 = vadd.f32 %v978_v36, %v660_v39 }
 0x874   : > { %v595_v42 = vadd.f32 %v593_v40, %v1497_v32  ;;  %1107 = vtanh.f32 %v663_v41  ;;  %v980_v45 = vmul.f32 -1.442695, %v663_v41 }
 0x876   : > { %1109 = vtanh.f32 %v595_v42  ;;  %v972_v50 = vmul.f32 -1.442695, %v595_v42 }
 0x877   : > { %1111 = vpow2.f32 %v980_v45 }
 0x87a   : > { %v1108_v43 = vpop.eup %1107 }
 0x87b   : > { %686 = vrot.lane.b32.xlu2 %v1108_v43, %s1256_s13 }
 0x87c   : > { %v1110_v44 = vpop.eup %1109 }
 0x87d   : > { %618 = vrot.lane.b32.xlu1 %v1110_v44, %s1256_s13  ;;  %v1112_v46 = vpop.eup %1111 }
 0x87e   : > { %v667_v47 = vadd.f32 1.0, %v1112_v46 }
 0x880   : > { %1113 = vrcp.f32 %v667_v47  ;;  %v679_v57 = vand.u32 2147483648, %v667_v47  ;;  %vm673_vm7 = vweird.f32 %v667_v47  ;;  %v677_v58 = vand.u32 2147483647, %v667_v47 }
 0x881   : > { %1115 = vpow2.f32 %v972_v50 }
 0x882   : > { %v680_v60 = vor.u32 1.1754944e-38, %v679_v57  ;;  %vm678_vm9 = vcmp.eq.f32.partialorder %v677_v58, 8.507059e+37 }
 0x886   : > { %v1114_v49 = vpop.eup %1113 }
 0x887   : > { %v669_v51 = vmul.f32 %v1114_v49, %v667_v47  ;;  %v1116_v54 = vpop.eup %1115  ;;  %vm674_vm6 = vweird.f32 %v1114_v49 }
 0x888   : > { %v599_v56 = vadd.f32 1.0, %v1116_v54  ;;  %vm675_vm8 = vmor %vm673_vm7, %vm674_vm6 }
 0x889   : > { %v670_v52 = vsub.f32 1.0, %v669_v51 }
 0x88a   : > { %1117 = vrcp.f32 %v599_v56  ;;  %v611_v18 = vand.u32 2147483648, %v599_v56  ;;  %vm605_vm11 = vweird.f32 %v599_v56  ;;  %v609_v19 = vand.u32 2147483647, %v599_v56 }
 0x88b   : > { %v671_v53 = vmul.f32 %v1114_v49, %v670_v52 }
 0x88c   : > { %v612_v22 = vor.u32 1.1754944e-38, %v611_v18  ;;  %vm610_vm13 = vcmp.eq.f32.partialorder %v609_v19, 8.507059e+37 }
 0x88d   : > { %v672_v55 = vadd.f32 %v1114_v49, %v671_v53 }
 0x88f   : > { %v676_v59 = vsel %vm675_vm8, %v1114_v49, %v672_v55 }
 0x890   : > { %v681_v62 = vsel %vm678_vm9, %v680_v60, %v676_v59  ;;  %v1118_v0 = vpop.eup %1117 }
 0x891   : > { %v601_v14 = vmul.f32 %v1118_v0, %v599_v56  ;;  %vm606_vm10 = vweird.f32 %v1118_v0  ;;  %v684_v48 = vmul.f32 %v681_v62, %v1535_v29 }
 0x892   : > { %vm607_vm12 = vmor %vm605_vm11, %vm606_vm10 }
 0x893   : > { %v602_v15 = vsub.f32 1.0, %v601_v14  ;;  %v802_v14 = vld [vmem:[#allocation7 + $0x10] sm:$0xff] (%p160_p0) }
 0x895   : > { %v603_v16 = vmul.f32 %v1118_v0, %v602_v15  ;;  %v801_v15 = vld [vmem:[#allocation7 + $0x8] sm:$0xff] (%p160_p0) }
 0x897   : > { %v604_v17 = vadd.f32 %v1118_v0, %v603_v16  ;;  %v800_v16 = vld [vmem:[#allocation7] sm:$0xff] (%p160_p0) }
 0x899   : > { %v608_v20 = vsel %vm607_vm12, %v1118_v0, %v604_v17  ;;  %v803_v0 = vld [vmem:[#allocation7 + $0x18] sm:$0xff] (%p160_p0) }
 0x89a   : > { %v613_v25 = vsel %vm610_vm13, %v612_v22, %v608_v20  ;;  %845 = vmatpush.msra.mxu0 (%p160_p0), %v803_v0  ;;  %1002 = vmatpush.msra.mxu1 (%p160_p0), %v803_v0 }
 0x89b   : > { %v616_v21 = vmul.f32 %v613_v25, %v1533_v28 }
 0x89c   :  { %846 = vmatpush.msra.mxu0 (%p160_p0), %v802_v14  ;;  %1005 = vmatpush.msra.mxu1 (%p160_p0), %v802_v14 }
 0x89e   :  { %847 = vmatpush.msra.mxu0 (%p160_p0), %v801_v15  ;;  %1008 = vmatpush.msra.mxu1 (%p160_p0), %v801_v15 }
 0x8a0   :  { %848 = vmatpush.msra.mxu0 (%p160_p0), %v800_v16  ;;  %1011 = vmatpush.msra.mxu1 (%p160_p0), %v800_v16 }
 0x8d5   : > { %v687_v61 = vpop.permute.xlu2 %686 }
 0x8d6   : > { %v689_v63 = vmul.f32 %v687_v61, %v681_v62 }
 0x8d8   : > { %691 = vrot.lane.b32.xlu1 %v689_v63, %s1256_s13 }
 0x8ef   : > { %v619_v24 = vpop.permute.xlu1 %618 }
 0x8f0   : > { %v621_v27 = vmul.f32 %v619_v24, %v613_v25 }
 0x8f2   : > { %623 = vrot.lane.b32.xlu0 %v621_v27, %s1256_s13 }
 0x94a   : > { %v692_v30 = vpop.permute.xlu1 %691 }
 0x94b   : > { %v1555_v50 = vadd.f32 %v692_v30, %v684_v48  }
 0x94d   : > { %1119 = vtanh.f32 %v1555_v50 }
 0x953   : > { %v1120_v31 = vpop.eup %1119 }
 0x954   : > { %697 = vrot.lane.b32.xlu0 %v1120_v31, %s1256_s13 }
 0x964   : > { %v624_v26 = vpop.permute.xlu0 %623 }
 0x965   : > { %v626_v23 = vadd.f32 %v624_v26, %v616_v21 }
 0x967   : > { %1121 = vtanh.f32 %v626_v23 }
 0x96d   : > { %v1122_v33 = vpop.eup %1121 }
 0x96e   : > { %629 = vrot.lane.b32.xlu2 %v1122_v33, %s1256_s13 }
 0x9c6   : > { %v698_v34 = vpop.permute.xlu0 %697 }
 0x9c7   : > { %v700_v51 = vmul.f32 %v698_v34, %v681_v62  }
 0x9c8   : > { %v630_v29 = vpop.permute.xlu2 %629 }
 0x9c9   : > { %v632_v35 = vmul.f32 %v630_v29, %v613_v25  ;;  %724 = vrot.lane.b32.xlu2 %v700_v51, %s1255_s1 }
 0x9cb   : > { %634 = vrot.lane.b32.xlu1 %v632_v35, %s1255_s1 }
 0xa23   : > { %v725_v36 = vpop.permute.xlu2 %724 }
 0xa24   : > { %982 = vmatmul.msk.f32.vlgmr.msra.gmra.mxu3 %vm175_vm0, %v725_v36 }
 0xa25   :  { %1004 = vmatpush.msra.mxu3 (%p160_p0), %v803_v0 }
 0xa27   :  { %1007 = vmatpush.msra.mxu3 (%p160_p0), %v802_v14 }
 0xa29   :  { %1010 = vmatpush.msra.mxu3 (%p160_p0), %v801_v15 }
 0xa2b   :  { %1013 = vmatpush.msra.mxu3 (%p160_p0), %v800_v16 }
 0xa3d   : > { %v635_v37 = vpop.permute.xlu1 %634 }
 0xa3e   : > { %975 = vst.msk [vmem:[%s1520_s2 + $0x10] sm:$0xff] %vm175_vm0, %v635_v37  ;;  %981 = vmatmul.msk.f32.vlgmr.msra.gmra.mxu2 %vm175_vm0, %v635_v37 }
 0xa3f   :  { %1003 = vmatpush.msra.mxu2 (%p160_p0), %v803_v0 }
 0xa41   :  { %1006 = vmatpush.msra.mxu2 (%p160_p0), %v802_v14 }
 0xa43   :  { %1009 = vmatpush.msra.mxu2 (%p160_p0), %v801_v15 }
 0xa45   :  { %1012 = vmatpush.msra.mxu2 (%p160_p0), %v800_v16 }
 0xaa7   : > { %v745_v28 = vpop.f32.mrf.mxu3 }
 0xac1   : > { %v720_v38 = vpop.f32.mrf.mxu2 }
 0xac2   : > { %v746_v39 = vadd.f32 %v745_v28, %v720_v38 }
 0xac4   : > { %v748_v40 = vadd.f32 %v746_v39, %v1497_v32 }
 0xac6   : > { %1123 = vtanh.f32 %v748_v40  ;;  %v983_v42 = vmul.f32 -1.442695, %v748_v40 }
 0xac8   : > { %1125 = vpow2.f32 %v983_v42 }
 0xacc   : > { %v1124_v41 = vpop.eup %1123 }
 0xacd   : > { %771 = vrot.lane.b32.xlu0 %v1124_v41, %s1256_s13 }
 0xace   : > { %v1126_v43 = vpop.eup %1125 }
 0xacf   : > { %v752_v44 = vadd.f32 1.0, %v1126_v43 }
 0xad1   : > { %1127 = vrcp.f32 %v752_v44  ;;  %v764_v53 = vand.u32 2147483648, %v752_v44  ;;  %vm758_vm15 = vweird.f32 %v752_v44  ;;  %v762_v54 = vand.u32 2147483647, %v752_v44 }
 0xad3   : > { %v765_v55 = vor.u32 1.1754944e-38, %v764_v53  ;;  %vm763_vm2 = vcmp.eq.f32.partialorder %v762_v54, 8.507059e+37 }
 0xad7   : > { %v1128_v45 = vpop.eup %1127 }
 0xad8   : > { %v754_v46 = vmul.f32 %v1128_v45, %v752_v44  ;;  %vm759_vm14 = vweird.f32 %v1128_v45 }
 0xad9   : > { %vm760_vm1 = vmor %vm758_vm15, %vm759_vm14 }
 0xada   : > { %v755_v47 = vsub.f32 1.0, %v754_v46 }
 0xadc   : > { %v756_v49 = vmul.f32 %v1128_v45, %v755_v47 }
 0xade   : > { %v757_v52 = vadd.f32 %v1128_v45, %v756_v49 }
 0xae0   : > { %v761_v32 = vsel %vm760_vm1, %v1128_v45, %v757_v52 }
 0xae1   : > { %v766_v57 = vsel %vm763_vm2, %v765_v55, %v761_v32 }
 0xae2   : > { %v769_v59 = vmul.f32 %v766_v57, %v626_v23 }
 0xb3f   : > { %v772_v56 = vpop.permute.xlu0 %771 }
 0xb40   : > { %v774_v58 = vmul.f32 %v772_v56, %v766_v57 }
 0xb42   : > { %776 = vrot.lane.b32.xlu1 %v774_v58, %s1256_s13 }
 0xbb4   : > { %v777_v60 = vpop.permute.xlu1 %776 }
 0xbb5   : > { %v779_v48 = vadd.f32 %v777_v60, %v769_v59  }
 0xbb7   : > { %1129 = vtanh.f32 %v779_v48 }
 0xbbd   : > { %v1130_v61 = vpop.eup %1129 }
 0xbbe   : > { %782 = vrot.lane.b32.xlu2 %v1130_v61, %s1256_s13 }
 0xc18   : > { %v783_v62 = vpop.permute.xlu2 %782 }
 0xc19   : > { %v785_v49 = vmul.f32 %v783_v62, %v766_v57  }
 0xc1b   : > { %787 = vrot.lane.b32.xlu0 %v785_v49, %s1255_s1 }
 0xc8a   :  { %162 = sbr.rel (!%p160_p0) target bundleno = 154 (0x9a), region = 79 }
 0xc8d   : > { %v788_v63 = vpop.permute.xlu0 %787 }
 0xc8e   : > { %986 = vst.msk [vmem:[%s1520_s2 + $0x18] sm:$0xff] %vm175_vm0, %v788_v63 }
 0xc95   :  { %v796_v17 = vld [vmem:[#allocation3 + $0x20] sm:$0xff]  ;;  %v798_v18 = vld [vmem:[#allocation3 + $0x30] sm:$0xff]  ;;  %v797_v3 = vld [vmem:[#allocation3 + $0x28] sm:$0xff] }
 0xc96   :  { %v792_v1 = vld [vmem:[#allocation3] sm:$0xff]  ;;  %v794_v2 = vld [vmem:[#allocation3 + $0x10] sm:$0xff]  ;;  %991 = vmatmul.msk.f32.vlgmr.msra.gmra.mxu2 %vm175_vm0, %v796_v17  ;;  %993 = vmatmul.msk.f32.vlgmr.msra.gmra.mxu3 %vm175_vm0, %v798_v18  ;;  %v799_v4 = vld [vmem:[#allocation3 + $0x38] sm:$0xff] }
 0xc97   :  { %987 = vmatmul.msk.f32.vlgmr.msra.gmra.mxu0 %vm175_vm0, %v792_v1  ;;  %989 = vmatmul.msk.f32.vlgmr.msra.gmra.mxu1 %vm175_vm0, %v794_v2  ;;  %v793_v5 = vld [vmem:[#allocation3 + $0x8] sm:$0xff]  ;;  %v795_v6 = vld [vmem:[#allocation3 + $0x18] sm:$0xff] }
 0xc9e   :  { %992 = vmatmul.msk.f32.gmra.mxu2 %vm175_vm0, %v797_v3  ;;  %994 = vmatmul.msk.f32.gmra.mxu3 %vm175_vm0, %v799_v4 }
 0xc9f   :  { %988 = vmatmul.msk.f32.gmra.mxu0 %vm175_vm0, %v793_v5  ;;  %990 = vmatmul.msk.f32.gmra.mxu1 %vm175_vm0, %v795_v6 }
 0xd14   :  { %v850_v8 = vpop.f32.mrf.mxu0  ;;  %v856_v9 = vpop.f32.mrf.mxu1 }
 0xd15   :  { %v851_v10 = vadd.f32 %v1131_v7, %v850_v8  ;;  %v857_v11 = vadd.f32 %v1131_v7, %v856_v9 }
 0xd17   :  { %874 = vst [vmem:[#allocation9] sm:$0xff] %v851_v10 }
 0xd18   :  { %876 = vst [vmem:[#allocation9 + $0x10] sm:$0xff] %v857_v11 }
 0xd19   :  { %v862_v12 = vpop.f32.mrf.mxu2  ;;  %v868_v13 = vpop.f32.mrf.mxu3 }
 0xd1a   :  { %v863_v50 = vadd.f32 %v1131_v7, %v862_v12  ;;  %v869_v51 = vadd.f32 %v1131_v7, %v868_v13 }
 0xd1c   :  { %878 = vst [vmem:[#allocation9 + $0x20] sm:$0xff] %v863_v50  ;;  %v853_v19 = vpop.f32.mrf.mxu0  ;;  %v859_v20 = vpop.f32.mrf.mxu1 }
 0xd1d   :  { %880 = vst [vmem:[#allocation9 + $0x30] sm:$0xff] %v869_v51  ;;  %v854_v22 = vadd.f32 %v1131_v7, %v853_v19  ;;  %v860_v24 = vadd.f32 %v1131_v7, %v859_v20 }
 0xd1f   :  { %875 = vst [vmem:[#allocation9 + $0x8] sm:$0xff] %v854_v22 }
 0xd20   :  { %877 = vst [vmem:[#allocation9 + $0x18] sm:$0xff] %v860_v24 }
 0xd21   :  { %v865_v25 = vpop.f32.mrf.mxu2  ;;  %v871_v27 = vpop.f32.mrf.mxu3 }
 0xd22   :  { %v866_v48 = vadd.f32 %v1131_v7, %v865_v25  ;;  %v872_v30 = vadd.f32 %v1131_v7, %v871_v27 }
 0xd24   :  { %879 = vst [vmem:[#allocation9 + $0x28] sm:$0xff] %v866_v48 }
 0xd25   :  { %881 = vst [vmem:[#allocation9 + $0x38] sm:$0xff] %v872_v30 }
 0xd26   :  { %894 = dma.vmem_to_hbm [thread:$0]  %s887_s19, 1024, %s889_s20, [#allocation6], %s1251_s17, %s1251_s17, %s1252_s18  }
 0xd27   :  { %1228 = dma.done.wait [#allocation6], 1024  }
 0xd28   :  { %1229 = vsyncadd [#allocation6], 4294966272 }
 0xd29   :  { %899 = vsyncpa [#allocation5], 1 }
 0xd2a   :  { %900 = vsyncpa [#allocation8], 1 }
 0xd2b   :  { %901 = vsyncpa [#allocation6], 1 }

</bundles_post_ra>
